<compile_context>
chip_gen: v5e
topology: v5e:2x2
jax: 0.10.0
libtpu: 0.0.40
codegen_flags: <defaults>
</compile_context>

<pallas_src>
import jax
import jax.numpy as jnp
from jax.experimental import pallas as pl
from jax.experimental.pallas import tpu as pltpu

SUBLANE = 8


def _round_up(x, m):
    return (x + m - 1) // m * m


def decoder_vae_kernel(x_ref, w1_ref, b1_ref, w2_ref, b2_ref, out_ref):
    # Layer 1: Linear + LeakyReLU(0.2); f32 accumulation on the MXU.
    x = x_ref[...].astype(w1_ref.dtype)          # free-ish VPU cast in VMEM
    h = jnp.dot(x, w1_ref[...], preferred_element_type=jnp.float32)
    h = h + b1_ref[...]                          # bias added in f32
    h = jnp.maximum(h, 0.2 * h)                  # LeakyReLU(0.2)
    # Layer 2: Linear -> lane-dense [tile_b, output_size] slab.
    h = h.astype(w2_ref.dtype)
    y = jnp.dot(h, w2_ref[...], preferred_element_type=jnp.float32)
    out_ref[...] = (y + b2_ref[...]).astype(out_ref.dtype)


def prepare_decoder_params(w1, b1, w2, b2, *, use_bf16=True):
    """One-time (init-path) parameter prep.

    Accepts PyTorch nn.Linear layout: w1 [hidden, latent], b1 [hidden],
    w2 [output, hidden], b2 [output].  Returns kernel-ready params:
    transposed [in, out] weights in bf16 (default) or f32, biases in f32 as
    [1, dim].  Done once so no pad/cast ops remain on the per-call path.
    """
    wdt = jnp.bfloat16 if use_bf16 else jnp.float32
    w1_t = jnp.asarray(w1, wdt).T                 # [latent, hidden]
    w2_t = jnp.asarray(w2, wdt).T                 # [hidden, output]
    b1_r = jnp.asarray(b1, jnp.float32).reshape(1, -1)
    b2_r = jnp.asarray(b2, jnp.float32).reshape(1, -1)
    return w1_t, b1_r, w2_t, b2_r


def decoder_vae_forward(x, params, *, tile_b=1024, out_dtype=jnp.float32):
    """Decoder_VAE forward.

    x:      [..., latent]  (leading dims flattened, like x.view(-1, output_size))
    params: output of prepare_decoder_params
    returns [B, output_size] in out_dtype
    """
    w1_t, b1, w2_t, b2 = params
    K, H = w1_t.shape
    N = w2_t.shape[1]

    x2 = x.reshape(-1, K)                         # nn.Linear acts on last dim
    B = x2.shape[0]

    # Batch tiling: 8-aligned, clamped to the (8-aligned) batch.
    tile_b = max(SUBLANE, min(_round_up(B, SUBLANE), _round_up(tile_b, SUBLANE)))
    B_pad = _round_up(B, tile_b)
    if B_pad != B:
        # Zero-pad rows only when needed (exact: padded rows are discarded below).
        x2 = jnp.zeros((B_pad, K), x2.dtype).at[:B].set(x2)
    grid = (B_pad // tile_b,)

    x_bytes = jnp.dtype(x2.dtype).itemsize
    w_bytes = jnp.dtype(w1_t.dtype).itemsize
    o_bytes = jnp.dtype(out_dtype).itemsize

    # VMEM estimate: resident weights/biases + double-buffered x/out tiles + h.
    vmem_est = (
        (K * H + H * N) * w_bytes
        + (H + N) * 4
        + 2 * tile_b * K * x_bytes
        + 2 * tile_b * N * o_bytes
        + tile_b * H * 4
    )
    vmem_limit = None
    if vmem_est > (32 << 20):
        # Leave headroom for compiler-internal scratch (v7x has 64 MiB total/TC).
        vmem_limit = min(_round_up(int(1.5 * vmem_est), 1 << 20), 48 << 20)

    cost = pl.CostEstimate(
        flops=2 * B_pad * (K * H + H * N),
        transcendentals=0,
        bytes_accessed=(
            x2.size * x_bytes
            + (w1_t.size + w2_t.size) * w_bytes
            + (b1.size + b2.size) * 4
            + B_pad * N * o_bytes
        ),
    )

    out = pl.pallas_call(
        decoder_vae_kernel,
        out_shape=jax.ShapeDtypeStruct((B_pad, N), out_dtype),
        grid_spec=pltpu.PrefetchScalarGridSpec(
            num_scalar_prefetch=0,
            grid=grid,
            in_specs=[
                pl.BlockSpec((tile_b, K), lambda i: (i, 0)),   # x tile (pipelined)
                pl.BlockSpec((K, H), lambda i: (0, 0)),        # w1 resident
                pl.BlockSpec((1, H), lambda i: (0, 0)),        # b1 resident
                pl.BlockSpec((H, N), lambda i: (0, 0)),        # w2 resident
                pl.BlockSpec((1, N), lambda i: (0, 0)),        # b2 resident
            ],
            out_specs=pl.BlockSpec((tile_b, N), lambda i: (i, 0)),
        ),
        compiler_params=pltpu.CompilerParams(
            dimension_semantics=("parallel",),   # shard batch grid across TCs
            vmem_limit_bytes=vmem_limit,
        ),
        cost_estimate=cost,
    )(x2, w1_t, b1, w2_t, b2)

    # No post-kernel slice unless the batch actually had to be padded.
    return out if B_pad == B else out[:B]


def reference_forward(x, w1_t, b1, w2_t, b2):
    hp = jax.lax.Precision.HIGHEST
    h = jnp.dot(x, w1_t, precision=hp) + b1
    h = jnp.where(h > 0, h, 0.2 * h)
    return jnp.dot(h, w2_t, precision=hp) + b2


if __name__ == "__main__":
    # Small shapes consistent with the module defaults.
    batch = 8
    latent_size = 32
    hidden = 128
    output_size = 100

    key = jax.random.PRNGKey(0)
    kx, kw1, kb1, kw2, kb2 = jax.random.split(key, 5)

    x = jax.random.normal(kx, (batch, latent_size), dtype=jnp.float32)

    # PyTorch nn.Linear layout: weight [out, in], bias [out].
    bound1 = 1.0 / (latent_size ** 0.5)
    w1 = jax.random.uniform(kw1, (hidden, latent_size), jnp.float32, -bound1, bound1)
    b1 = jax.random.uniform(kb1, (hidden,), jnp.float32, -bound1, bound1)
    bound2 = 1.0 / (hidden ** 0.5)
    w2 = jax.random.uniform(kw2, (output_size, hidden), jnp.float32, -bound2, bound2)
    b2 = jax.random.uniform(kb2, (output_size,), jnp.float32, -bound2, bound2)

    out_ref = reference_forward(x, w1.T, b1, w2.T, b2)

    # f32 weights path.
    params_f32 = prepare_decoder_params(w1, b1, w2, b2, use_bf16=False)
    out_f32 = decoder_vae_forward(x, params_f32)
    jax.block_until_ready(out_f32)
    assert out_f32.shape == (batch, output_size)
    assert jnp.allclose(out_f32, out_ref, atol=2e-3, rtol=2e-3)

    # bf16 weights (default), f32 MXU accumulation, f32 output.
    params_bf16 = prepare_decoder_params(w1, b1, w2, b2, use_bf16=True)
    out_b = decoder_vae_forward(x, params_bf16)
    jax.block_until_ready(out_b)
    assert out_b.shape == (batch, output_size)
    assert jnp.allclose(out_b, out_ref, atol=6e-2, rtol=6e-2)

    # bf16 output slab (halves the output HBM stream when downstream tolerates it).
    out_bo = decoder_vae_forward(x, params_bf16, out_dtype=jnp.bfloat16)
    jax.block_until_ready(out_bo)
    assert out_bo.shape == (batch, output_size)
    assert out_bo.dtype == jnp.bfloat16
    assert jnp.allclose(out_bo.astype(jnp.float32), out_ref, atol=1e-1, rtol=1e-1)

    print("KERNEL_OK")
</pallas_src>

<mosaic_0001>
module attributes {stable_mosaic.version = 11 : i64} {
  func.func @decoder_vae_kernel(%arg0: i32, %arg1: memref<8x32xf32, #tpu.memory_space<vmem>>, %arg2: memref<32x128xf32, #tpu.memory_space<vmem>>, %arg3: memref<1x128xf32, #tpu.memory_space<vmem>>, %arg4: memref<128x100xf32, #tpu.memory_space<vmem>>, %arg5: memref<1x100xf32, #tpu.memory_space<vmem>>, %arg6: memref<8x100xf32, #tpu.memory_space<vmem>>) attributes {dimension_semantics = [#tpu.dimension_semantics<parallel>], iteration_bounds = array<i64: 1>, scalar_prefetch = 0 : i64, scratch_operands = 0 : i64, tpu.core_type = #tpu.core_type<tc>, window_params = [{transform_indices = @transform_0, window_bounds = array<i64: 8, 32>}, {pipeline_mode = #tpu.pipeline_mode<synchronous>, transform_indices = @transform_1, window_bounds = array<i64: 32, 128>}, {pipeline_mode = #tpu.pipeline_mode<synchronous>, transform_indices = @transform_2, window_bounds = array<i64: 1, 128>}, {pipeline_mode = #tpu.pipeline_mode<synchronous>, transform_indices = @transform_3, window_bounds = array<i64: 128, 100>}, {pipeline_mode = #tpu.pipeline_mode<synchronous>, transform_indices = @transform_4, window_bounds = array<i64: 1, 100>}, {transform_indices = @transform_5, window_bounds = array<i64: 8, 100>}]} {
    %c0 = arith.constant 0 : index
    %c0_0 = arith.constant 0 : index
    %0 = vector.load %arg1[%c0, %c0_0] : memref<8x32xf32, #tpu.memory_space<vmem>>, vector<8x32xf32>
    %c0_1 = arith.constant 0 : index
    %c0_2 = arith.constant 0 : index
    %1 = vector.load %arg2[%c0_1, %c0_2] : memref<32x128xf32, #tpu.memory_space<vmem>>, vector<32x128xf32>
    %cst = arith.constant dense<0.000000e+00> : vector<8x128xf32>
    %2 = tpu.matmul %0, %1, %cst {dimension_numbers = #tpu.dot_dimension_numbers<[1], [0], [0], [1], [0, 0, 1, 1], [], []>} : vector<8x32xf32>, vector<32x128xf32>, vector<8x128xf32> -> vector<8x128xf32>
    %c0_3 = arith.constant 0 : index
    %c0_4 = arith.constant 0 : index
    %3 = vector.load %arg3[%c0_3, %c0_4] : memref<1x128xf32, #tpu.memory_space<vmem>>, vector<1x128xf32>
    %4 = vector.broadcast %3 : vector<1x128xf32> to vector<8x128xf32>
    %5 = arith.addf %2, %4 : vector<8x128xf32>
    %cst_5 = arith.constant 2.000000e-01 : f32
    %6 = vector.broadcast %cst_5 : f32 to vector<8x128xf32>
    %7 = arith.mulf %6, %5 : vector<8x128xf32>
    %8 = arith.maximumf %5, %7 : vector<8x128xf32>
    %c0_6 = arith.constant 0 : index
    %c0_7 = arith.constant 0 : index
    %9 = vector.load %arg4[%c0_6, %c0_7] : memref<128x100xf32, #tpu.memory_space<vmem>>, vector<128x100xf32>
    %cst_8 = arith.constant dense<0.000000e+00> : vector<8x100xf32>
    %10 = tpu.matmul %8, %9, %cst_8 {dimension_numbers = #tpu.dot_dimension_numbers<[1], [0], [0], [1], [0, 0, 1, 1], [], []>} : vector<8x128xf32>, vector<128x100xf32>, vector<8x100xf32> -> vector<8x100xf32>
    %c0_9 = arith.constant 0 : index
    %c0_10 = arith.constant 0 : index
    %11 = vector.load %arg5[%c0_9, %c0_10] : memref<1x100xf32, #tpu.memory_space<vmem>>, vector<1x100xf32>
    %12 = vector.broadcast %11 : vector<1x100xf32> to vector<8x100xf32>
    %13 = arith.addf %10, %12 : vector<8x100xf32>
    %c0_11 = arith.constant 0 : index
    %c0_12 = arith.constant 0 : index
    %14 = vector.load %arg6[%c0_11, %c0_12] : memref<8x100xf32, #tpu.memory_space<vmem>>, vector<8x100xf32>
    tpu.vector_store %arg6[%c0_11, %c0_12], %13 {strides = array<i32>} : memref<8x100xf32, #tpu.memory_space<vmem>>, vector<8x100xf32>,
    return
  }
  func.func @transform_0(%arg0: i32) -> (i32, i32) {
    %c0_i32 = arith.constant 0 : i32
    %c0_i32_0 = arith.constant 0 : i32
    return %arg0, %c0_i32 : i32, i32
  }
  func.func @transform_1(%arg0: i32) -> (i32, i32) {
    %c0_i32 = arith.constant 0 : i32
    %c0_i32_0 = arith.constant 0 : i32
    %c0_i32_1 = arith.constant 0 : i32
    return %c0_i32, %c0_i32_0 : i32, i32
  }
  func.func @transform_2(%arg0: i32) -> (i32, i32) {
    %c0_i32 = arith.constant 0 : i32
    %c0_i32_0 = arith.constant 0 : i32
    %c0_i32_1 = arith.constant 0 : i32
    return %c0_i32, %c0_i32_0 : i32, i32
  }
  func.func @transform_3(%arg0: i32) -> (i32, i32) {
    %c0_i32 = arith.constant 0 : i32
    %c0_i32_0 = arith.constant 0 : i32
    %c0_i32_1 = arith.constant 0 : i32
    return %c0_i32, %c0_i32_0 : i32, i32
  }
  func.func @transform_4(%arg0: i32) -> (i32, i32) {
    %c0_i32 = arith.constant 0 : i32
    %c0_i32_0 = arith.constant 0 : i32
    %c0_i32_1 = arith.constant 0 : i32
    return %c0_i32, %c0_i32_0 : i32, i32
  }
  func.func @transform_5(%arg0: i32) -> (i32, i32) {
    %c0_i32 = arith.constant 0 : i32
    %c0_i32_0 = arith.constant 0 : i32
    return %arg0, %c0_i32 : i32, i32
  }
}

</mosaic_0001>

<bundles_post_ra>
// kernel: tpu_custom_call.1
= control target key start
LH: loop header
LB: loop body
LE: loop exit
PB: predicated region body
PF: predicated region fallthrough
CT: control target
= control target key end

     0   :  { %vm30_vm0 = vcmask 261120   ;;  %s247_s0 = inlined_call_operand.vmem [shape: f32[8,32], index: 0, kind: input, shape index: {}]   ;;  %s248_s1 = inlined_call_operand.vmem [shape: f32[32,128], index: 1, kind: input, shape index: {}]   ;;  %s249_s2 = inlined_call_operand.vmem [shape: f32[1,128], index: 2, kind: input, shape index: {}]   ;;  %s250_s3 = inlined_call_operand.vmem [shape: f32[128,100], index: 3, kind: input, shape index: {}]   ;;  %s251_s4 = inlined_call_operand.vmem [shape: f32[1,100], index: 4, kind: input, shape index: {}]   ;;  %s252_s5 = inlined_call_operand.hbm [shape: f32[8,100], index: 5, kind: output, shape index: {}]  }
   0x1   :  { %v25_v0 = vld [vmem:[%s248_s1 + $0x18] sm:$0xff]  ;;  %v24_v1 = vld [vmem:[%s248_s1 + $0x10] sm:$0xff]  ;;  %v23_v3 = vld [vmem:[%s248_s1 + $0x8] sm:$0xff] }
   0x2   :  { %46 = vmatpush.msra.mxu0 %v25_v0  ;;  %v71_v2 = vld [vmem:[%s250_s3 + $0x78] sm:$0xff]  ;;  %v70_v4 = vld [vmem:[%s250_s3 + $0x70] sm:$0xff]  ;;  %v69_v5 = vld [vmem:[%s250_s3 + $0x68] sm:$0xff] }
   0x3   :  { %76 = vmatpush.msra.mxu1 %v71_v2  ;;  %v22_v6 = vld [vmem:[%s248_s1] sm:$0xff] }
   0x4   :  { %47 = vmatpush.msra.mxu0 %v24_v1  ;;  %v21_v7 = vld [vmem:[%s247_s0] sm:$0xff] }
   0x5   :  { %77 = vmatpush.msra.mxu1 %v70_v4  ;;  %v68_v8 = vld [vmem:[%s250_s3 + $0x60] sm:$0xff] }
   0x6   :  { %48 = vmatpush.msra.mxu0 %v23_v3 }
   0x7   :  { %78 = vmatpush.msra.mxu1 %v69_v5 }
   0x8   :  { %10 = vsyncpa [#allocation3], 0  ;;  %49 = vmatpush.msra.mxu0 %v22_v6  ;;  %v67_v9 = vld [vmem:[%s250_s3 + $0x58] sm:$0xff]  ;;  %v66_v10 = vld [vmem:[%s250_s3 + $0x50] sm:$0xff]  ;;  %s144_s12 = smov [#allocation2]   ;;  %vm96_vm1 = vcmask 818176  }
   0x9   :  { %114 = vmatmul.msk.f32.vlgmr.msra.gmra.mxu0 %vm30_vm0, %v21_v7  ;;  %79 = vmatpush.msra.mxu1 %v68_v8  ;;  %v65_v11 = vld [vmem:[%s250_s3 + $0x48] sm:$0xff]  ;;  %v64_v12 = vld [vmem:[%s250_s3 + $0x40] sm:$0xff]  ;;  %v63_v13 = vld [vmem:[%s250_s3 + $0x38] sm:$0xff]  ;;  %s103_s1 = sshll.u32 %s144_s12, 4  ;;  %s104_s1 = int_to_ptr.vmem [resolvable:$true] %s103_s1 }
   0xa   :  { %v62_v14 = vld [vmem:[%s250_s3 + $0x30] sm:$0xff]  ;;  %v61_v15 = vld [vmem:[%s250_s3 + $0x28] sm:$0xff]  ;;  %v60_v16 = vld [vmem:[%s250_s3 + $0x20] sm:$0xff] }
   0xb   :  { %80 = vmatpush.msra.mxu1 %v67_v9  ;;  %v59_v17 = vld [vmem:[%s250_s3 + $0x18] sm:$0xff]  ;;  %v58_v18 = vld [vmem:[%s250_s3 + $0x10] sm:$0xff]  ;;  %v57_v19 = vld [vmem:[%s250_s3 + $0x8] sm:$0xff] }
   0xc   :  { %v56_v20 = vld [vmem:[%s250_s3] sm:$0xff]  ;;  %s105_s3 = sshll.u32 %s252_s5, 4  ;;  %s106_s3 = int_to_ptr.hbm [resolvable:$true] %s105_s3 }
   0xd   :  { %81 = vmatpush.msra.mxu1 %v66_v10  ;;  %v116_v21 = vld [vmem:[%s249_s2] ss:$0 sm:$0xff] }
   0xe   :  { %v117_v26 = vld [vmem:[%s251_s4] ss:$0 sm:$0xff] }
   0xf   :  { %82 = vmatpush.msra.mxu1 %v65_v11 }
  0x11   :  { %83 = vmatpush.msra.mxu1 %v64_v12 }
  0x13   :  { %84 = vmatpush.msra.mxu1 %v63_v13 }
  0x15   :  { %85 = vmatpush.msra.mxu1 %v62_v14 }
  0x17   :  { %86 = vmatpush.msra.mxu1 %v61_v15 }
  0x19   :  { %87 = vmatpush.msra.mxu1 %v60_v16 }
  0x1b   :  { %88 = vmatpush.msra.mxu1 %v59_v17 }
  0x1d   :  { %89 = vmatpush.msra.mxu1 %v58_v18 }
  0x1f   :  { %90 = vmatpush.msra.mxu1 %v57_v19 }
  0x21   :  { %91 = vmatpush.msra.mxu1 %v56_v20 }
  0x86   :  { %v51_v22 = vpop.f32.mrf.mxu0 }
  0x87   :  { %v52_v23 = vadd.f32 %v116_v21, %v51_v22 }
  0x89   :  { %v54_v24 = vmul.f32 0.2, %v52_v23 }
  0x8b   :  { %v55_v25 = vmax.f32 %v52_v23, %v54_v24 }
  0x8d   :  { %92 = vmatmul.f32.vlgmr.msra.gmra.mxu1 %v55_v25 }
 0x10a   :  { %v93_v27 = vpop.f32.mrf.mxu1 }
 0x10b   :  { %v94_v28 = vadd.f32 %v117_v26, %v93_v27 }
 0x10d   :  { %97 = vst.msk [vmem:[#allocation2] sm:$0xff] %vm96_vm1, %v94_v28 }
 0x10e   :  { %108 = dma.vmem_to_hbm [thread:$0]  %s104_s1, 128, %s106_s3, [#allocation3]  }
 0x10f   :  { %142 = dma.done.wait [#allocation3], 128  }
 0x110   :  { %143 = vsyncadd [#allocation3], 4294967168 }
 0x111   :  { %113 = vsyncpa [#allocation3], 1 }

</bundles_post_ra>
